<compile_context>
chip_gen: v7x
topology: tpu7x:2x2x1
jax: 0.10.0
libtpu: 0.0.40
codegen_flags: <defaults>
</compile_context>

<pallas_src>
import jax
import jax.numpy as jnp
from jax.experimental import pallas as pl
from jax.experimental.pallas import tpu as pltpu


def _focus_conv_kernel(x_ref, w_ref, b_ref, o_ref):
    # x_ref: (1, 4C, tm)   w_ref: (Cout, 4C)   b_ref: (Cout, 1)   o_ref: (1, Cout, tm)
    x = x_ref[0]                                  # (4C, tm)
    y = jnp.dot(w_ref[...], x, preferred_element_type=jnp.float32)  # (Cout, tm)
    y = y + b_ref[...]                            # fused BN bias (broadcast over lanes)
    y = y * jax.nn.sigmoid(y)                     # SiLU (EUP)
    o_ref[0] = y.astype(o_ref.dtype)


def focus_pallas(x, w, gamma, beta, mean, var, *, eps=1e-5, tm=2048):
    """Focus forward.

    x:     (B, C, H, W)        input, H and W even
    w:     (Cout, 4C, 1, 1)    1x1 conv weight (bias=False, as in BaseConv default)
    gamma, beta, mean, var:    (Cout,) BatchNorm2d parameters / running stats
    """
    B, C, H, W = x.shape
    Cout = w.shape[0]
    assert H % 2 == 0 and W % 2 == 0, "Focus requires even H and W"
    Hh, Wh = H // 2, W // 2
    M = Hh * Wh
    C4 = 4 * C

    # --- space-to-depth: channel order (dx, dy, c) == cat(TL, BL, TR, BR) ---
    # x6[b, c, i, dy, j, dx] = x[b, c, 2i+dy, 2j+dx]
    x6 = x.reshape(B, C, Hh, 2, Wh, 2)
    x4 = jnp.transpose(x6, (0, 5, 3, 1, 2, 4)).reshape(B, C4, M)

    # --- fuse BatchNorm (eval) into the 1x1 conv: scale + bias per out channel ---
    scale = gamma * jax.lax.rsqrt(var + eps)                  # (Cout,)
    w_eff = (w[:, :, 0, 0] * scale[:, None]).astype(jnp.float32)   # (Cout, 4C)
    b_eff = (beta - mean * scale).reshape(Cout, 1).astype(jnp.float32)

    # --- lane-dense spatial tiling: tm multiple of 128, pad M up to a multiple ---
    m_ceil = pl.cdiv(M, 128) * 128
    tm = min(tm, m_ceil)
    tm = max(128, (tm // 128) * 128)
    M_pad = pl.cdiv(M, tm) * tm
    if M_pad != M:
        x4 = jnp.pad(x4, ((0, 0), (0, 0), (0, M_pad - M)))

    grid = (B, M_pad // tm)

    x_spec = pl.BlockSpec((1, C4, tm), lambda b, m: (b, 0, m))
    w_spec = pl.BlockSpec((Cout, C4), lambda b, m: (0, 0))
    b_spec = pl.BlockSpec((Cout, 1), lambda b, m: (0, 0))
    o_spec = pl.BlockSpec((1, Cout, tm), lambda b, m: (b, 0, m))

    itemsize = jnp.dtype(x.dtype).itemsize
    cost = pl.CostEstimate(
        flops=int(2 * B * M_pad * C4 * Cout),
        transcendentals=int(B * M_pad * Cout),
        bytes_accessed=int((B * C4 * M_pad + B * Cout * M_pad) * itemsize
                           + (Cout * C4 + Cout) * 4),
    )

    out = pl.pallas_call(
        _focus_conv_kernel,
        out_shape=jax.ShapeDtypeStruct((B, Cout, M_pad), x.dtype),
        grid_spec=pltpu.PrefetchScalarGridSpec(
            num_scalar_prefetch=0,
            grid=grid,
            in_specs=[x_spec, w_spec, b_spec],
            out_specs=o_spec,
        ),
        compiler_params=pltpu.CompilerParams(
            dimension_semantics=("parallel", "parallel"),
        ),
        cost_estimate=cost,
    )(x4, w_eff, b_eff)

    # Output is already NCHW-ordered; just drop padding and unflatten spatial.
    return out[:, :, :M].reshape(B, Cout, Hh, Wh)


if __name__ == "__main__":
    key = jax.random.PRNGKey(0)
    B, C, H, W = 2, 4, 16, 16
    Cout = 8

    keys = jax.random.split(key, 6)
    x = jax.random.normal(keys[0], (B, C, H, W), dtype=jnp.float32)
    # Conv2d(4C, Cout, 1, bias=False) weight + BatchNorm2d params / running stats.
    w = jax.random.normal(keys[1], (Cout, 4 * C, 1, 1), dtype=jnp.float32) * 0.1
    gamma = 1.0 + 0.1 * jax.random.normal(keys[2], (Cout,), dtype=jnp.float32)
    beta = 0.1 * jax.random.normal(keys[3], (Cout,), dtype=jnp.float32)
    mean = 0.1 * jax.random.normal(keys[4], (Cout,), dtype=jnp.float32)
    var = jax.random.uniform(keys[5], (Cout,), minval=0.5, maxval=1.5,
                             dtype=jnp.float32)

    y = focus_pallas(x, w, gamma, beta, mean, var)
    jax.block_until_ready(y)

    # --- pure-JAX reference mirroring PyTorch Focus.forward (eval-mode BN) ---
    tl = x[..., ::2, ::2]
    tr = x[..., ::2, 1::2]
    bl = x[..., 1::2, ::2]
    br = x[..., 1::2, 1::2]
    xcat = jnp.concatenate((tl, bl, tr, br), axis=1)            # (B, 4C, H/2, W/2)
    conv = jnp.einsum("bchw,oc->bohw", xcat, w[:, :, 0, 0])
    eps = 1e-5
    s = (gamma * jax.lax.rsqrt(var + eps))[None, :, None, None]
    bn = (conv - mean[None, :, None, None]) * s + beta[None, :, None, None]
    ref = bn * jax.nn.sigmoid(bn)                               # SiLU

    assert y.shape == (B, Cout, H // 2, W // 2)
    assert jnp.allclose(y, ref, atol=1e-4, rtol=1e-4), float(jnp.max(jnp.abs(y - ref)))

    print("KERNEL_OK")
</pallas_src>

<mosaic_0001>
module attributes {stable_mosaic.version = 11 : i64} {
  func.func @_focus_conv_kernel(%arg0: i32, %arg1: i32, %arg2: memref<1x16x128xf32, #tpu.memory_space<vmem>>, %arg3: memref<8x16xf32, #tpu.memory_space<vmem>>, %arg4: memref<8x1xf32, #tpu.memory_space<vmem>>, %arg5: memref<1x8x128xf32, #tpu.memory_space<vmem>>) attributes {dimension_semantics = [#tpu.dimension_semantics<parallel>, #tpu.dimension_semantics<parallel>], iteration_bounds = array<i64: 2, 1>, scalar_prefetch = 0 : i64, scratch_operands = 0 : i64, tpu.core_type = #tpu.core_type<tc>, window_params = [{transform_indices = @transform_0, window_bounds = array<i64: 1, 16, 128>}, {pipeline_mode = #tpu.pipeline_mode<synchronous>, transform_indices = @transform_1, window_bounds = array<i64: 8, 16>}, {pipeline_mode = #tpu.pipeline_mode<synchronous>, transform_indices = @transform_2, window_bounds = array<i64: 8, 1>}, {transform_indices = @transform_3, window_bounds = array<i64: 1, 8, 128>}]} {
    %c0 = arith.constant 0 : index
    %c0_0 = arith.constant 0 : index
    %c0_1 = arith.constant 0 : index
    %0 = vector.load %arg2[%c0, %c0_0, %c0_1] : memref<1x16x128xf32, #tpu.memory_space<vmem>>, vector<1x16x128xf32>
    %1 = vector.shape_cast %0 : vector<1x16x128xf32> to vector<16x128xf32>
    %c0_2 = arith.constant 0 : index
    %c0_3 = arith.constant 0 : index
    %2 = vector.load %arg3[%c0_2, %c0_3] : memref<8x16xf32, #tpu.memory_space<vmem>>, vector<8x16xf32>
    %cst = arith.constant dense<0.000000e+00> : vector<8x128xf32>
    %3 = tpu.matmul %2, %1, %cst {dimension_numbers = #tpu.dot_dimension_numbers<[1], [0], [0], [1], [0, 0, 1, 1], [], []>} : vector<8x16xf32>, vector<16x128xf32>, vector<8x128xf32> -> vector<8x128xf32>
    %c0_4 = arith.constant 0 : index
    %c0_5 = arith.constant 0 : index
    %4 = vector.load %arg4[%c0_4, %c0_5] : memref<8x1xf32, #tpu.memory_space<vmem>>, vector<8x1xf32>
    %5 = vector.broadcast %4 : vector<8x1xf32> to vector<8x128xf32>
    %6 = arith.addf %3, %5 : vector<8x128xf32>
    %7 = arith.negf %6 : vector<8x128xf32>
    %8 = math.exp %7 : vector<8x128xf32>
    %cst_6 = arith.constant 1.000000e+00 : f32
    %9 = vector.broadcast %cst_6 : f32 to vector<8x128xf32>
    %10 = arith.addf %9, %8 : vector<8x128xf32>
    %11 = arith.divf %9, %10 : vector<8x128xf32>
    %12 = arith.mulf %6, %11 : vector<8x128xf32>
    %c0_7 = arith.constant 0 : index
    %c0_8 = arith.constant 0 : index
    %c0_9 = arith.constant 0 : index
    %13 = vector.load %arg5[%c0_7, %c0_8, %c0_9] : memref<1x8x128xf32, #tpu.memory_space<vmem>>, vector<1x8x128xf32>
    %14 = vector.shape_cast %13 : vector<1x8x128xf32> to vector<8x128xf32>
    %15 = vector.shape_cast %12 : vector<8x128xf32> to vector<1x8x128xf32>
    tpu.vector_store %arg5[%c0_7, %c0_8, %c0_9], %15 {strides = array<i32>} : memref<1x8x128xf32, #tpu.memory_space<vmem>>, vector<1x8x128xf32>,
    return
  }
  func.func @transform_0(%arg0: i32, %arg1: i32) -> (i32, i32, i32) {
    %c0_i32 = arith.constant 0 : i32
    %c0_i32_0 = arith.constant 0 : i32
    return %arg0, %c0_i32, %arg1 : i32, i32, i32
  }
  func.func @transform_1(%arg0: i32, %arg1: i32) -> (i32, i32) {
    %c0_i32 = arith.constant 0 : i32
    %c0_i32_0 = arith.constant 0 : i32
    %c0_i32_1 = arith.constant 0 : i32
    return %c0_i32, %c0_i32_0 : i32, i32
  }
  func.func @transform_2(%arg0: i32, %arg1: i32) -> (i32, i32) {
    %c0_i32 = arith.constant 0 : i32
    %c0_i32_0 = arith.constant 0 : i32
    %c0_i32_1 = arith.constant 0 : i32
    return %c0_i32, %c0_i32_0 : i32, i32
  }
  func.func @transform_3(%arg0: i32, %arg1: i32) -> (i32, i32, i32) {
    %c0_i32 = arith.constant 0 : i32
    %c0_i32_0 = arith.constant 0 : i32
    return %arg0, %c0_i32, %arg1 : i32, i32, i32
  }
}

</mosaic_0001>

<bundles_post_ra>
// kernel: tpu_custom_call.1
= control target key start
LH: loop header
LB: loop body
LE: loop exit
PB: predicated region body
PF: predicated region fallthrough
CT: control target
= control target key end

     0   :  { %8 = vsyncpa [#allocation3], 0  ;;  %s818_s0 = inlined_call_operand.hbm [shape: f32[2,16,128], index: 0, kind: input, shape index: {}]   ;;  %s819_s1 = inlined_call_operand.vmem [shape: f32[8,16], index: 1, kind: input, shape index: {}]   ;;  %s820_s2 = inlined_call_operand.vmem [shape: f32[8,1], index: 2, kind: input, shape index: {}]   ;;  %s821_s3 = inlined_call_operand.hbm [shape: f32[2,8,128], index: 3, kind: output, shape index: {}]  }
   0x1   :  { %10 = vsyncpa [#allocation3 + $0x1], 0 }
   0x2   :  { %11 = vsyncpa [#allocation4], 0 }
   0x3   :  { %13 = vsyncpa [#allocation4 + $0x1], 0  ;;  %s638_s12 = smov 0   ;;  %s640_s13 = smov 0  }
   0x4   :  { %s642_s14 = smov 0   ;;  %s644_s15 = smov 0  }
   0x5   :  { %s646_s16 = smov 0   ;;  %s648_s17 = smov 0  }
   0x6 LB: > { %s393_s18 = sadd.s32 4294967295, %s608_s17   ;;  %s394_s19 = sadd.s32 4294967294, %s608_s17   ;;  %s608_s17 = sphi %s648_s17, %s19_s17   ;;  %s604_s16 = sphi %s646_s16, %s836_s16   ;;  %s600_s15 = sphi %s644_s15, %s835_s15   ;;  %s596_s14 = sphi %s642_s14, %s834_s14   ;;  %s592_s13 = sphi %s640_s13, %s833_s13   ;;  %s588_s12 = sphi %s638_s12, %s832_s12  }
   0x7   : > { %s31_s20 = sadd.s32 1, %s604_s16  ;;  %s40_s21 = sadd.s32 1, %s596_s14 }
   0x8   : > { %p33_p0 = scmp.ge.s32.totalorder %s31_s20, 2  ;;  %p47_p1 = scmp.ne.s32.totalorder %s596_s14, %s592_s13 }
   0x9   : > { %p48_p2 = scmp.eq.s32.totalorder %s608_s17, 0  ;;  %p53_p3 = scmp.ne.s32.totalorder %s592_s13, %s588_s12 }
   0xa   : > { %s838_s20 = smov (%p33_p0, %s31_s20), 0  ;;  %p54_p5 = scmp.eq.s32.totalorder %s393_s18, 0 }
   0xb   : > { %p679_p4 = por %p48_p2, %p47_p1  ;;  %s35_s23 = ssub.s32 %s604_s16, %s838_s20 }
   0xc   : > { %p121_p6 = scmp.eq.s32.totalorder %s393_s18, 1  ;;  %p38_p7 = scmp.eq.s32.totalorder %s35_s23, 0 }
   0xd   : > { %p685_p8 = por %p54_p5, %p53_p3  ;;  %p127_p10 = scmp.eq.s32.totalorder %s394_s19, 1 }
   0xe   : > { %p689_p9 = por %p121_p6, %p47_p1  ;;  %p435_p13 = scmp.lt.s32.totalorder %s608_s17, 2 }
   0xf   : > { %s694_s26 = scalar_select %p38_p7, %s596_s14, %s40_s21  }
  0x10   : > { %s825_s25 = scalar_select %p689_p9, 1, 0 }
  0x11   : > { %p696_p11 = por %p127_p10, %p53_p3  ;;  %s153_s28 = sand.u32 1, %s596_s14  }
  0x12   : > { %s397_s29 = sshll.u32 %s153_s28, 4  ;;  %s409_s30 = sshll.u32 %s604_s16, 8 }
  0x13   : > { %s826_s27 = scalar_select %p696_p11, 1, 0 }
  0x14   : > { %s707_s6 = scalar_lea.hbm %s818_s0, %s409_s30  ;;  %s157_s7 = scalar_lea.vmem [#allocation2], %s397_s29 }
  0x15   : > { %s165_s8 = sshll.u32 %s157_s7, 4  ;;  %p713_p0 = pnand %p435_p13, %p679_p4  ;;  %s709_s8 = int_to_ptr.vmem [resolvable:$true] %s165_s8 }
  0x16   : > { %s718_s10 = scalar_lea.sflag [#allocation3], %s153_s28  ;;  %s496_s11 = scalar_lea.hbm %s707_s6, 256 }
  0x17   : > { %p497_p2 = scmp.ne.s32.totalorder %s707_s6, %s496_s11  ;;  %p498_p3 = pneg %p713_p0 }
  0x18   : > { %s501_s21 = scalar_lea.hbm %s818_s0, 512  ;;  %p502_p4 = scmp.lt.u32.totalorder %s707_s6, %s818_s0 }
  0x19   : > { %p499_p5 = pnand %p498_p3, %p497_p2  ;;  %p503_p7 = scmp.lt.u32.totalorder %s501_s21, %s496_s11 }
  0x1a   : > { %p505_p13 = scmp.lt.u32.totalorder %s496_s11, %s707_s6 }
  0x1b   : > { %p500_p6 = pneg %p499_p5  ;;  %p504_p10 = por %p503_p7, %p502_p4 }
  0x1d   : > { %p506_p12 = por %p505_p13, %p504_p10 }
  0x1f   : > { %p507_p1 = pnand %p506_p12, %p500_p6 }
  0x21   : > { %510 = shalt.err (!%p507_p1)
}
  0x22   : > { %s511_s28 = scalar_lea.vmem %s709_s8, 256  ;;  %s610_s29 = smov [#allocation2]  }
  0x23   : > { %p512_p2 = scmp.ne.s32.totalorder %s709_s8, %s511_s28  ;;  %s516_s30 = sshll.u32 %s610_s29, 4  ;;  %s517_s30 = int_to_ptr.vmem [resolvable:$false] %s516_s30 }
  0x24   : > { %s518_s4 = scalar_lea.vmem %s517_s30, 512  ;;  %p519_p9 = scmp.lt.s32.totalorder %s709_s8, %s517_s30 }
  0x25   : > { %p514_p5 = pnand %p512_p2, %p498_p3  ;;  %p520_p4 = scmp.lt.s32.totalorder %s518_s4, %s511_s28 }
  0x27   : > { %p515_p11 = pneg %p514_p5  ;;  %p521_p7 = por %p520_p4, %p519_p9 }
  0x29   : > { %p522_p10 = pnand %p521_p7, %p515_p11 }
  0x2b   : > { %525 = shalt.err (!%p522_p10)
}
  0x2c   : > { %s611_s5 = smov 128   ;;  %s612_s7 = smov 8  }
  0x2d   : > { %430 = dma.hbm_to_vmem [thread:$0]  (!%p713_p0), %s707_s6, 256, %s709_s8, %s718_s10, %s611_s5, %s611_s5, %s612_s7  }
  0x2e   : > { %p173_p12 = scmp.lt.s32.totalorder %s608_s17, 3  ;;  %p828_p1 = scmp.ge.s32.totalorder %s608_s17, 1 }
  0x30   : > { %p174_p3 = pnand %p828_p1, %p173_p12 }
  0x31   : > { %s750_s11 = sand.u32 (!%p174_p3), 1, %s592_s13  }
  0x32   : > { %177 = sbr.rel (%p174_p3) target bundleno = 321 (0x141), region = 32  ;;  %s401_s18 = sshll.u32 (!%p174_p3), %s750_s11, 4 }
  0x33   : > { %s180_s19 = scalar_lea.sflag (!%p174_p3), [#allocation3], %s750_s11  ;;  %s183_s21 = scalar_lea.vmem (!%p174_p3), [#allocation2], %s401_s18 }
  0x39   : > { %579 = dma.done.wait (%p685_p8), %s180_s19, 256  }
  0x3a   : > { %581 = vsyncadd (%p685_p8), %s180_s19, 4294967040  ;;  %v613_v0 = vmov 0.0|0.0   ;;  %vm614_vm0 = vmmov 0   ;;  %v615_v1 = vmov 0.0   ;;  %v616_v2 = vmov 0   ;;  %v206_v3 = vld [vmem:[%s183_s21] sm:$0xff] }
  0x3b   : > { %420 = vmatprep.subr.bf16.mxu0 %v613_v0  ;;  %417 = vmatprep.mubr.msk.f32.mxu0 %vm614_vm0, %v615_v1  ;;  %v207_v4 = vld [vmem:[%s183_s21 + $0x8] sm:$0xff]  ;;  %v209_v6 = vld [vmem:[%s820_s2] sm:$0xff]  ;;  %vm215_vm1 = vcmask 130048   ;;  %s402_s10 = sshll.u32 %s750_s11, 3  ;;  %s406_s22 = sshll.u32 %s600_s15, 7 }
  0x3c   : > { %491 = vset.pattern.permute.xlu0 %v616_v2  ;;  %v421_v5 = vpack.c.bf16 %v207_v4, %v206_v3  ;;  %v208_v7 = vld [vmem:[%s819_s1] sm:$0xff]  ;;  %s205_s23 = scalar_lea.vmem [#allocation5], %s402_s10  ;;  %s769_s4 = scalar_lea.hbm %s821_s3, %s406_s22 }
  0x3d   : > { %212 = vperm.xlu0 %491, %v209_v6   ;;  %s312_s28 = sshll.u32 %s205_s23, 4  ;;  %s298_s5 = scalar_lea.sflag [#allocation4], %s750_s11  ;;  %s771_s28 = int_to_ptr.vmem [resolvable:$true] %s312_s28 }
  0x3e   : > { %422 = vmatpush3.bf16.msra.mxu0 %v421_v5  ;;  %s526_s7 = scalar_lea.vmem %s771_s28, 128  ;;  %p829_p9 = scmp.ne.s32.totalorder %s825_s25, 0 }
  0x3f   : > { %p527_p8 = scmp.ne.s32.totalorder %s771_s28, %s526_s7  ;;  %s617_s15 = smov [#allocation5]  }
  0x40   : > { %s530_s18 = sshll.u32 %s617_s15, 4  ;;  %s531_s18 = int_to_ptr.vmem [resolvable:$false] %s530_s18 }
  0x41   : > { %418 = vmatmul.mubr.msk.f32.vlgmr.msra.gmra.mrb[0].mxu0 %vm215_vm1, %v208_v7  ;;  %p528_p11 = pnand %p527_p8, %p829_p9  ;;  %s532_s19 = scalar_lea.vmem %s531_s18, 256 }
  0x42   : > { %p533_p6 = scmp.lt.s32.totalorder %s771_s28, %s531_s18  ;;  %p534_p13 = scmp.lt.s32.totalorder %s532_s19, %s526_s7 }
  0x43   : > { %p529_p0 = pneg %p528_p11 }
  0x44   : > { %p535_p2 = por %p534_p13, %p533_p6 }
  0x46   : > { %p536_p5 = pnand %p535_p2, %p529_p0 }
  0xbc   : > { %v213_v8 = vpop.permute.xlu0 %212 }
 0x114   : > { %v285_v9 = vpop.f32.mrb[0].mxu0 }
 0x115   : > { %v286_v10 = vadd.f32 %v285_v9, %v213_v8  ;;  %v419_v11 = vpop.f32.mrb[1].mxu0 }
 0x117   : > { %v404_v12 = vmul.f32 -1.442695, %v286_v10 }
 0x119   : > { %492 = vpow2.f32 %v404_v12 }
 0x123   : > { %v493_v13 = vpop.eup %492 }
 0x124   : > { %v292_v14 = vadd.f32 1.0, %v493_v13 }
 0x126   : > { %494 = vrcp.f32 %v292_v14 }
 0x130   : > { %v495_v15 = vpop.eup %494 }
 0x131   : > { %v295_v16 = vmul.f32 %v495_v15, %v286_v10 }
 0x133   : > { %296 = vst [vmem:[%s205_s23] sm:$0xff] %v295_v16 }
 0x134   : > { %539 = shalt.err (!%p536_p5)
}
 0x135   : > { %s540_s11 = scalar_lea.hbm %s769_s4, 128  ;;  %s544_s8 = scalar_lea.hbm %s821_s3, 256 }
 0x136   : > { %p541_p4 = scmp.ne.s32.totalorder %s769_s4, %s540_s11  ;;  %p545_p12 = scmp.lt.u32.totalorder %s769_s4, %s821_s3 }
 0x137   : > { %p546_p1 = scmp.lt.u32.totalorder %s544_s8, %s540_s11  ;;  %p548_p8 = scmp.lt.u32.totalorder %s540_s11, %s769_s4 }
 0x138   : > { %p542_p7 = pnand %p541_p4, %p829_p9 }
 0x139   : > { %p547_p3 = por %p546_p1, %p545_p12 }
 0x13a   : > { %p543_p10 = pneg %p542_p7 }
 0x13b   : > { %p549_p11 = por %p548_p8, %p547_p3 }
 0x13d   : > { %p550_p0 = pnand %p549_p11, %p543_p10 }
 0x13f   : > { %553 = shalt.err (!%p550_p0)
}
 0x140   : > { %425 = dma.vmem_to_hbm [thread:$0]  (%p829_p9), %s771_s28, 128, %s769_s4, %s298_s5  }
 0x141 PF: > { %s324_s10 = sand.u32 1, %s588_s12   ;;  %p830_p6 = scmp.ne.s32.totalorder %s826_s27, 0 }
 0x142   : > { %p831_p13 = scmp.ge.s32.totalorder %s608_s17, 2  ;;  %s325_s22 = scalar_lea.sflag [#allocation4], %s324_s10 }
 0x144   : > { %p432_p2 = pnand %p831_p13, %p830_p6 }
 0x146   : > { %583 = dma.done.wait (!%p432_p2), %s325_s22, 128  }
 0x147   : > { %585 = vsyncadd (!%p432_p2), %s325_s22, 4294967168  ;;  %s19_s17 = sadd.s32 1, %s608_s17   ;;  %s832_s12 = smov %s592_s13 }
 0x148   : > { %p16_p5 = scmp.ge.s32.totalorder %s19_s17, 4   ;;  %s833_s13 = smov %s596_s14 }
 0x149   : > { %s834_s14 = smov %s694_s26  ;;  %s835_s15 = smov %s604_s16 }
 0x14a   : > { %s836_s16 = smov %s838_s20  ;;  %18 = sbr.rel (!%p16_p5) target bundleno = 6 (0x6), region = 77 }
 0x151   :  { %330 = vsyncpa [#allocation3], 1 }
 0x152   :  { %332 = vsyncpa [#allocation3 + $0x1], 1 }
 0x153   :  { %333 = vsyncpa [#allocation4], 1 }
 0x154   :  { %335 = vsyncpa [#allocation4 + $0x1], 1 }

</bundles_post_ra>
